<compile_context>
chip_gen: v5e
topology: v5e:2x2
jax: 0.10.0
libtpu: 0.0.40
codegen_flags: <defaults>
</compile_context>

<pallas_src>
import math
from functools import partial

import jax
import jax.numpy as jnp
from jax.experimental import pallas as pl
from jax.experimental.pallas import tpu as pltpu

_LANE = 128
_SUBLANE_BF16 = 16


def _round_up(x, m):
    return ((x + m - 1) // m) * m


def _pick_tm(n):
    """Row-tile size: minimize padded rows + per-step overhead, prefer grid>=2.

    Candidates are multiples of 16 so bf16 streams satisfy the (16, 128) tile
    constraint. (On v6e/v5e with large N, 1024 would also be fine; 512 is kept
    as the cap to stay friendly to v7x's 64 MiB VMEM and 2-TC grid split.)
    """
    best_tm, best_cost = 16, None
    for tm in (512, 256, 128, 64, 32, 16):
        n_pad = _round_up(n, tm)
        grid = n_pad // tm
        waste = n_pad - n
        cost = n_pad + waste + 100 * grid      # rows-equivalent heuristic
        if grid < 2:
            cost += n                           # single-step grid: no overlap
        if best_cost is None or cost < best_cost:
            best_tm, best_cost = tm, cost
    return best_tm


# ---------------------------------------------------------------------------
# Kernel
# ---------------------------------------------------------------------------
def _lstm_cell_kernel(x_ref, h_ref, c_ref, wx_ref, wh_ref, b_ref,
                      h_out_ref, c_out_ref):
    hp = c_ref.shape[-1]                      # padded hidden size (x128)

    # Two MXU passes on resident bf16 weights, f32 accumulation. No concat temp.
    gates = jnp.dot(x_ref[...], wx_ref[...], preferred_element_type=jnp.float32)
    gates = gates + jnp.dot(h_ref[...], wh_ref[...],
                            preferred_element_type=jnp.float32)
    gates = gates + b_ref[...]                # (1, 4Hp) broadcast over rows

    # Lane-aligned gate slices (Hp multiple of 128); elementwise math in f32.
    i_g = jax.nn.sigmoid(gates[:, 0 * hp:1 * hp])
    f_g = jax.nn.sigmoid(gates[:, 1 * hp:2 * hp])
    g_g = jnp.tanh(gates[:, 2 * hp:3 * hp])
    o_g = jax.nn.sigmoid(gates[:, 3 * hp:4 * hp])

    c = c_ref[...]                            # f32 state
    c_new = f_g * c + i_g * g_g
    h_new = o_g * jnp.tanh(c_new)

    h_out_ref[...] = h_new.astype(h_out_ref.dtype)   # bf16 stream
    c_out_ref[...] = c_new                           # f32 state


def lstm_cell_pallas(x_p, h_p, c_p, w_x, w_h, bias, *, tm):
    """One LSTMCell step on pre-padded operands.

    x_p: (Np, Ip) bf16, h_p: (Np, Hp) bf16, c_p: (Np, Hp) f32,
    w_x: (Ip, 4Hp) bf16, w_h: (Hp, 4Hp) bf16, bias: (1, 4Hp) f32.
    Np divisible by tm (tm multiple of 16), Ip/Hp multiples of 128.
    """
    np_, ip = x_p.shape
    _, hp = c_p.shape
    g4 = 4 * hp
    assert w_x.shape == (ip, g4) and w_h.shape == (hp, g4)
    assert ip % _LANE == 0 and hp % _LANE == 0
    assert tm % _SUBLANE_BF16 == 0 and np_ % tm == 0
    grid = (np_ // tm,)

    row = lambda shape: pl.BlockSpec(shape, lambda i: (i, 0))        # streamed
    resident = lambda shape: pl.BlockSpec(shape, lambda i: (0, 0))   # in VMEM

    # VMEM budget: resident weights + double-buffered streamed tiles + gates.
    w_bytes = (ip + hp) * g4 * 2 + g4 * 4
    stream_bytes = tm * (ip * 2 + hp * 2 + hp * 4 + hp * 2 + hp * 4)
    scratch_bytes = 2 * tm * g4 * 4
    vmem_est = w_bytes + 2 * stream_bytes + scratch_bytes
    vmem_limit = int(min(32 << 20, max(2 * vmem_est, 8 << 20)))

    out_shape = (jax.ShapeDtypeStruct((np_, hp), jnp.bfloat16),
                 jax.ShapeDtypeStruct((np_, hp), jnp.float32))

    # TODO(synk): input_output_aliases (h_p->h_out, c_p->c_out) skipped —
    # donating caller-visible state arrays here would be unsafe in general.
    return pl.pallas_call(
        _lstm_cell_kernel,
        out_shape=out_shape,
        grid=grid,
        in_specs=[row((tm, ip)), row((tm, hp)), row((tm, hp)),
                  resident((ip, g4)), resident((hp, g4)), resident((1, g4))],
        out_specs=(row((tm, hp)), row((tm, hp))),
        compiler_params=pltpu.CompilerParams(
            dimension_semantics=("parallel",),
            vmem_limit_bytes=vmem_limit),
    )(x_p, h_p, c_p, w_x, w_h, bias)


@partial(jax.jit, static_argnames=("tm", "n_pad", "i_pad", "n", "h"))
def _forward_step(x2d, h_pad, c_pad, w_x, w_h, bias, *, tm, n_pad, i_pad, n, h):
    """reshape/pad + kernel + user-visible slice, all fused under jit."""
    ni, i = x2d.shape
    x_p = jnp.pad(x2d.astype(jnp.bfloat16), ((0, n_pad - ni), (0, i_pad - i)))
    h_new_p, c_new_p = lstm_cell_pallas(x_p, h_pad, c_pad, w_x, w_h, bias, tm=tm)
    h_vis = h_new_p[:n, :h].astype(jnp.float32)
    return h_new_p, c_new_p, h_vis


# ---------------------------------------------------------------------------
# Module
# ---------------------------------------------------------------------------
class MemoryLasagnaTime:
    """JAX/Pallas port of FlowQA's recurrent-cell step (rnn_type='lstm', eval)."""

    def __init__(self, input_size, hidden_size, key):
        self.input_size = input_size
        self.hidden_size = hidden_size
        i, h = input_size, hidden_size
        self.i_pad = _round_up(i, _LANE)
        self.h_pad = _round_up(h, _LANE)
        ip, hp = self.i_pad, self.h_pad

        k1, k2, k3, k4 = jax.random.split(key, 4)
        bound = 1.0 / math.sqrt(hidden_size)
        # PyTorch LSTMCell shapes: W_ih (4H, I), W_hh (4H, H), biases (4H,).
        w_ih = jax.random.uniform(k1, (4 * h, i), jnp.float32, -bound, bound)
        w_hh = jax.random.uniform(k2, (4 * h, h), jnp.float32, -bound, bound)
        b_ih = jax.random.uniform(k3, (4 * h,), jnp.float32, -bound, bound)
        b_hh = jax.random.uniform(k4, (4 * h,), jnp.float32, -bound, bound)

        # f32 originals for the reference check.
        self.w_ih_t_f32 = jnp.transpose(w_ih)                 # (I, 4H)
        self.w_hh_t_f32 = jnp.transpose(w_hh)                 # (H, 4H)
        self.bias_f32 = (b_ih + b_hh).reshape(1, 4 * h)

        # Per-gate lane-padded, row-padded weights for the kernel:
        #   cols = [i | f | g | o], each gate padded H -> Hp with zeros
        #   (zero weight + zero bias padding keeps pad lanes of the state == 0).
        def pad_gate_cols(w):                                 # (K, 4H) -> (K, 4Hp)
            kdim = w.shape[0]
            w4 = w.reshape(kdim, 4, h)
            w4 = jnp.pad(w4, ((0, 0), (0, 0), (0, hp - h)))
            return w4.reshape(kdim, 4 * hp)

        self.w_x = jnp.pad(pad_gate_cols(self.w_ih_t_f32),
                           ((0, ip - i), (0, 0))).astype(jnp.bfloat16)
        self.w_h = jnp.pad(pad_gate_cols(self.w_hh_t_f32),
                           ((0, hp - h), (0, 0))).astype(jnp.bfloat16)

        b4 = (b_ih + b_hh).reshape(4, h)
        self.bias = jnp.pad(b4, ((0, 0), (0, hp - h))).reshape(1, 4 * hp)

    def get_init(self, sample_tensor):
        # eval mode: no dropout mask needed.
        b, t = sample_tensor.shape[0], sample_tensor.shape[1]
        n = b * t
        tm = _pick_tm(n)
        n_pad = _round_up(n, tm)
        h_vis = jnp.zeros((b, t, self.hidden_size), jnp.float32)
        # Carried state is kept padded (and h in bf16) across recurrent steps.
        h_pad = jnp.zeros((n_pad, self.h_pad), jnp.bfloat16)
        c_pad = jnp.zeros((n_pad, self.h_pad), jnp.float32)
        return h_vis, (h_pad, c_pad)

    def forward(self, x, memory):
        # TODO(synk): training-time dropout mask multiply omitted (eval semantics).
        b, t = x.shape[0], x.shape[1]
        i, h = self.input_size, self.hidden_size
        ip, hp = self.i_pad, self.h_pad
        n = b * t
        tm = _pick_tm(n)
        n_pad = _round_up(n, tm)

        h0, c0 = memory
        if h0.shape != (n_pad, hp):   # accept raw (n, H) state as well
            h0 = jnp.pad(h0.astype(jnp.bfloat16),
                         ((0, n_pad - h0.shape[0]), (0, hp - h0.shape[1])))
            c0 = jnp.pad(c0.astype(jnp.float32),
                         ((0, n_pad - c0.shape[0]), (0, hp - c0.shape[1])))

        x2d = x.reshape(n, i).astype(jnp.float32)
        h_new_p, c_new_p, h_vis = _forward_step(
            x2d, h0, c0, self.w_x, self.w_h, self.bias,
            tm=tm, n_pad=n_pad, i_pad=ip, n=n, h=h)
        return h_vis.reshape(b, t, h), (h_new_p, c_new_p)


# ---------------------------------------------------------------------------
# References for the self-check.
# ---------------------------------------------------------------------------
def _ref_step_padded(x_p, h_p, c_p, w_x, w_h, bias):
    """Mirrors the kernel (bf16 streams/weights, f32 accumulation & state)."""
    hp = c_p.shape[-1]
    g = (jnp.dot(x_p, w_x, preferred_element_type=jnp.float32)
         + jnp.dot(h_p, w_h, preferred_element_type=jnp.float32) + bias)
    i = jax.nn.sigmoid(g[:, :hp]);       f = jax.nn.sigmoid(g[:, hp:2 * hp])
    gg = jnp.tanh(g[:, 2 * hp:3 * hp]);  o = jax.nn.sigmoid(g[:, 3 * hp:])
    c = f * c_p + i * gg
    h = o * jnp.tanh(c)
    return h.astype(jnp.bfloat16), c


def _ref_step_f32(x2d, h, c, w_ih_t, w_hh_t, bias):
    """Full-f32 PyTorch LSTMCell semantics (unpadded)."""
    hd = h.shape[-1]
    g = x2d @ w_ih_t + h @ w_hh_t + bias
    i = jax.nn.sigmoid(g[:, :hd]);       f = jax.nn.sigmoid(g[:, hd:2 * hd])
    gg = jnp.tanh(g[:, 2 * hd:3 * hd]);  o = jax.nn.sigmoid(g[:, 3 * hd:])
    c2 = f * c + i * gg
    return o * jnp.tanh(c2), c2


if __name__ == "__main__":
    key = jax.random.PRNGKey(0)
    kx, kp = jax.random.split(key)

    B, T, I, H = 2, 8, 32, 32          # N = B*T = 16 rows
    module = MemoryLasagnaTime(I, H, kp)

    x = jax.random.normal(kx, (B, T, I), jnp.float32)
    _, memory = module.get_init(x)

    # Two recurrent steps so the h/c feedback path is exercised.
    h, memory = module.forward(x, memory)
    h, memory = module.forward(x, memory)
    h_pad, c_pad = memory
    jax.block_until_ready((h, h_pad, c_pad))

    n = B * T
    Ip, Hp = module.i_pad, module.h_pad
    tm = _pick_tm(n)
    n_pad = _round_up(n, tm)

    # --- tight check: kernel vs identically-quantized (bf16) JAX reference ---
    x2d = x.reshape(n, I)
    xp = jnp.pad(x2d, ((0, n_pad - n), (0, Ip - I))).astype(jnp.bfloat16)
    h_ref = jnp.zeros((n_pad, Hp), jnp.bfloat16)
    c_ref = jnp.zeros((n_pad, Hp), jnp.float32)
    for _ in range(2):
        h_ref, c_ref = _ref_step_padded(xp, h_ref, c_ref,
                                        module.w_x, module.w_h, module.bias)
    h_out = h_pad[:n, :H].astype(jnp.float32)
    assert jnp.allclose(h_out, h_ref[:n, :H].astype(jnp.float32),
                        atol=1e-2, rtol=1e-2)          # bf16 h: 1-ulp slack
    assert jnp.allclose(c_pad[:n, :H], c_ref[:n, :H], atol=2e-4, rtol=2e-4)
    # padded state lanes must stay exactly zero (what makes carrying it safe)
    assert jnp.all(c_pad[:n, H:] == 0.0)

    # --- loose check: kernel vs full-f32 LSTMCell semantics ---
    hf = jnp.zeros((n, H), jnp.float32)
    cf = jnp.zeros((n, H), jnp.float32)
    for _ in range(2):
        hf, cf = _ref_step_f32(x2d, hf, cf, module.w_ih_t_f32, module.w_hh_t_f32,
                               module.bias_f32)
    assert jnp.allclose(h_out, hf, atol=5e-2, rtol=5e-2)
    assert jnp.allclose(c_pad[:n, :H], cf, atol=5e-2, rtol=5e-2)

    assert h.shape == (B, T, H)
    assert jnp.allclose(h, h_out.reshape(B, T, H), atol=1e-6, rtol=0)

    print("KERNEL_OK")
</pallas_src>

<mosaic_0001>
module attributes {stable_mosaic.version = 11 : i64} {
  func.func @_lstm_cell_kernel(%arg0: i32, %arg1: memref<16x128xbf16, #tpu.memory_space<vmem>>, %arg2: memref<16x128xbf16, #tpu.memory_space<vmem>>, %arg3: memref<16x128xf32, #tpu.memory_space<vmem>>, %arg4: memref<128x512xbf16, #tpu.memory_space<vmem>>, %arg5: memref<128x512xbf16, #tpu.memory_space<vmem>>, %arg6: memref<1x512xf32, #tpu.memory_space<vmem>>, %arg7: memref<16x128xbf16, #tpu.memory_space<vmem>>, %arg8: memref<16x128xf32, #tpu.memory_space<vmem>>) attributes {dimension_semantics = [#tpu.dimension_semantics<parallel>], iteration_bounds = array<i64: 1>, scalar_prefetch = 0 : i64, scratch_operands = 0 : i64, tpu.core_type = #tpu.core_type<tc>, window_params = [{transform_indices = @transform_0, window_bounds = array<i64: 16, 128>}, {transform_indices = @transform_1, window_bounds = array<i64: 16, 128>}, {transform_indices = @transform_2, window_bounds = array<i64: 16, 128>}, {pipeline_mode = #tpu.pipeline_mode<synchronous>, transform_indices = @transform_3, window_bounds = array<i64: 128, 512>}, {pipeline_mode = #tpu.pipeline_mode<synchronous>, transform_indices = @transform_4, window_bounds = array<i64: 128, 512>}, {pipeline_mode = #tpu.pipeline_mode<synchronous>, transform_indices = @transform_5, window_bounds = array<i64: 1, 512>}, {transform_indices = @transform_6, window_bounds = array<i64: 16, 128>}, {transform_indices = @transform_7, window_bounds = array<i64: 16, 128>}]} {
    %c0 = arith.constant 0 : index
    %c0_0 = arith.constant 0 : index
    %0 = vector.load %arg1[%c0, %c0_0] : memref<16x128xbf16, #tpu.memory_space<vmem>>, vector<16x128xbf16>
    %c0_1 = arith.constant 0 : index
    %c0_2 = arith.constant 0 : index
    %1 = vector.load %arg4[%c0_1, %c0_2] : memref<128x512xbf16, #tpu.memory_space<vmem>>, vector<128x512xbf16>
    %cst = arith.constant dense<0.000000e+00> : vector<16x512xf32>
    %2 = tpu.matmul %0, %1, %cst {dimension_numbers = #tpu.dot_dimension_numbers<[1], [0], [0], [1], [0, 0, 1, 1], [], []>} : vector<16x128xbf16>, vector<128x512xbf16>, vector<16x512xf32> -> vector<16x512xf32>
    %c0_3 = arith.constant 0 : index
    %c0_4 = arith.constant 0 : index
    %3 = vector.load %arg2[%c0_3, %c0_4] : memref<16x128xbf16, #tpu.memory_space<vmem>>, vector<16x128xbf16>
    %c0_5 = arith.constant 0 : index
    %c0_6 = arith.constant 0 : index
    %4 = vector.load %arg5[%c0_5, %c0_6] : memref<128x512xbf16, #tpu.memory_space<vmem>>, vector<128x512xbf16>
    %cst_7 = arith.constant dense<0.000000e+00> : vector<16x512xf32>
    %5 = tpu.matmul %3, %4, %cst_7 {dimension_numbers = #tpu.dot_dimension_numbers<[1], [0], [0], [1], [0, 0, 1, 1], [], []>} : vector<16x128xbf16>, vector<128x512xbf16>, vector<16x512xf32> -> vector<16x512xf32>
    %6 = arith.addf %2, %5 : vector<16x512xf32>
    %c0_8 = arith.constant 0 : index
    %c0_9 = arith.constant 0 : index
    %7 = vector.load %arg6[%c0_8, %c0_9] : memref<1x512xf32, #tpu.memory_space<vmem>>, vector<1x512xf32>
    %8 = vector.broadcast %7 : vector<1x512xf32> to vector<16x512xf32>
    %9 = arith.addf %6, %8 : vector<16x512xf32>
    %10 = vector.extract_strided_slice %9 {offsets = [0, 0], sizes = [16, 128], strides = [1, 1]} : vector<16x512xf32> to vector<16x128xf32>
    %11 = arith.negf %10 : vector<16x128xf32>
    %12 = math.exp %11 : vector<16x128xf32>
    %cst_10 = arith.constant 1.000000e+00 : f32
    %13 = vector.broadcast %cst_10 : f32 to vector<16x128xf32>
    %14 = arith.addf %13, %12 : vector<16x128xf32>
    %15 = arith.divf %13, %14 : vector<16x128xf32>
    %16 = vector.extract_strided_slice %9 {offsets = [0, 128], sizes = [16, 128], strides = [1, 1]} : vector<16x512xf32> to vector<16x128xf32>
    %17 = arith.negf %16 : vector<16x128xf32>
    %18 = math.exp %17 : vector<16x128xf32>
    %cst_11 = arith.constant 1.000000e+00 : f32
    %19 = vector.broadcast %cst_11 : f32 to vector<16x128xf32>
    %20 = arith.addf %19, %18 : vector<16x128xf32>
    %21 = arith.divf %19, %20 : vector<16x128xf32>
    %22 = vector.extract_strided_slice %9 {offsets = [0, 256], sizes = [16, 128], strides = [1, 1]} : vector<16x512xf32> to vector<16x128xf32>
    %23 = math.tanh %22 : vector<16x128xf32>
    %24 = vector.extract_strided_slice %9 {offsets = [0, 384], sizes = [16, 128], strides = [1, 1]} : vector<16x512xf32> to vector<16x128xf32>
    %25 = arith.negf %24 : vector<16x128xf32>
    %26 = math.exp %25 : vector<16x128xf32>
    %cst_12 = arith.constant 1.000000e+00 : f32
    %27 = vector.broadcast %cst_12 : f32 to vector<16x128xf32>
    %28 = arith.addf %27, %26 : vector<16x128xf32>
    %29 = arith.divf %27, %28 : vector<16x128xf32>
    %c0_13 = arith.constant 0 : index
    %c0_14 = arith.constant 0 : index
    %30 = vector.load %arg3[%c0_13, %c0_14] : memref<16x128xf32, #tpu.memory_space<vmem>>, vector<16x128xf32>
    %31 = arith.mulf %21, %30 : vector<16x128xf32>
    %32 = arith.mulf %15, %23 : vector<16x128xf32>
    %33 = arith.addf %31, %32 : vector<16x128xf32>
    %34 = math.tanh %33 : vector<16x128xf32>
    %35 = arith.mulf %29, %34 : vector<16x128xf32>
    %36 = arith.truncf %35 : vector<16x128xf32> to vector<16x128xbf16>
    %c0_15 = arith.constant 0 : index
    %c0_16 = arith.constant 0 : index
    %37 = vector.load %arg7[%c0_15, %c0_16] : memref<16x128xbf16, #tpu.memory_space<vmem>>, vector<16x128xbf16>
    tpu.vector_store %arg7[%c0_15, %c0_16], %36 {strides = array<i32>} : memref<16x128xbf16, #tpu.memory_space<vmem>>, vector<16x128xbf16>,
    %c0_17 = arith.constant 0 : index
    %c0_18 = arith.constant 0 : index
    %38 = vector.load %arg8[%c0_17, %c0_18] : memref<16x128xf32, #tpu.memory_space<vmem>>, vector<16x128xf32>
    tpu.vector_store %arg8[%c0_17, %c0_18], %33 {strides = array<i32>} : memref<16x128xf32, #tpu.memory_space<vmem>>, vector<16x128xf32>,
    return
  }
  func.func @transform_0(%arg0: i32) -> (i32, i32) {
    %c0_i32 = arith.constant 0 : i32
    %c0_i32_0 = arith.constant 0 : i32
    return %arg0, %c0_i32 : i32, i32
  }
  func.func @transform_1(%arg0: i32) -> (i32, i32) {
    %c0_i32 = arith.constant 0 : i32
    %c0_i32_0 = arith.constant 0 : i32
    return %arg0, %c0_i32 : i32, i32
  }
  func.func @transform_2(%arg0: i32) -> (i32, i32) {
    %c0_i32 = arith.constant 0 : i32
    %c0_i32_0 = arith.constant 0 : i32
    return %arg0, %c0_i32 : i32, i32
  }
  func.func @transform_3(%arg0: i32) -> (i32, i32) {
    %c0_i32 = arith.constant 0 : i32
    %c0_i32_0 = arith.constant 0 : i32
    %c0_i32_1 = arith.constant 0 : i32
    return %c0_i32, %c0_i32_0 : i32, i32
  }
  func.func @transform_4(%arg0: i32) -> (i32, i32) {
    %c0_i32 = arith.constant 0 : i32
    %c0_i32_0 = arith.constant 0 : i32
    %c0_i32_1 = arith.constant 0 : i32
    return %c0_i32, %c0_i32_0 : i32, i32
  }
  func.func @transform_5(%arg0: i32) -> (i32, i32) {
    %c0_i32 = arith.constant 0 : i32
    %c0_i32_0 = arith.constant 0 : i32
    %c0_i32_1 = arith.constant 0 : i32
    return %c0_i32, %c0_i32_0 : i32, i32
  }
  func.func @transform_6(%arg0: i32) -> (i32, i32) {
    %c0_i32 = arith.constant 0 : i32
    %c0_i32_0 = arith.constant 0 : i32
    return %arg0, %c0_i32 : i32, i32
  }
  func.func @transform_7(%arg0: i32) -> (i32, i32) {
    %c0_i32 = arith.constant 0 : i32
    %c0_i32_0 = arith.constant 0 : i32
    return %arg0, %c0_i32 : i32, i32
  }
}

</mosaic_0001>

<bundles_post_ra>
// kernel: _forward_step.1
= control target key start
LH: loop header
LB: loop body
LE: loop exit
PB: predicated region body
PF: predicated region fallthrough
CT: control target
= control target key end

     0   :  { %13 = vsyncpa [#allocation3], 0  ;;  %s1331_s0 = inlined_call_operand.vmem [shape: bf16[16,128], index: 0, kind: input, shape index: {}]   ;;  %s1332_s1 = inlined_call_operand.vmem [shape: bf16[16,128], index: 1, kind: input, shape index: {}]   ;;  %s1333_s2 = inlined_call_operand.vmem [shape: f32[16,128], index: 2, kind: input, shape index: {}]   ;;  %s1334_s3 = inlined_call_operand.hbm [shape: bf16[128,512], index: 3, kind: input, shape index: {}]   ;;  %s1335_s4 = inlined_call_operand.hbm [shape: bf16[128,512], index: 4, kind: input, shape index: {}]   ;;  %s1336_s5 = inlined_call_operand.vmem [shape: f32[1,512], index: 5, kind: input, shape index: {}]   ;;  %s1337_s6 = inlined_call_operand.vmem [shape: bf16[16,128], index: 6, kind: output, shape index: {0}]   ;;  %s1338_s7 = inlined_call_operand.hbm [shape: f32[16,128], index: 7, kind: output, shape index: {1}]  }
   0x1   :  { %14 = vsyncpa [#allocation6], 0 }
   0x2   :  { %15 = vsyncpa [#allocation4], 0  ;;  %s26_s26 = sshll.u32 %s1334_s3, 4  ;;  %s1204_s27 = smov [#allocation2]   ;;  %s27_s26 = int_to_ptr.hbm [resolvable:$true] %s26_s26 }
   0x3   :  { %s28_s28 = sshll.u32 %s1204_s27, 4  ;;  %s39_s8 = sshll.u32 %s1335_s4, 4  ;;  %s29_s28 = int_to_ptr.vmem [resolvable:$true] %s28_s28  ;;  %s40_s8 = int_to_ptr.hbm [resolvable:$true] %s39_s8 }
   0x4   :  { %s1205_s9 = smov 256   ;;  %s1206_s10 = smov 16  }
   0x5   :  { %34 = dma.hbm_to_vmem [thread:$0]  %s27_s26, 4096, %s29_s28, [#allocation3], %s1205_s9, %s1205_s9, %s1206_s10  }
   0x6   :  { %s1207_s11 = smov [#allocation5]  }
   0x7   :  { %s41_s12 = sshll.u32 %s1207_s11, 4  ;;  %s42_s12 = int_to_ptr.vmem [resolvable:$true] %s41_s12 }
   0x8   :  { %47 = dma.hbm_to_vmem [thread:$0]  %s40_s8, 4096, %s42_s12, [#allocation6], %s1205_s9, %s1205_s9, %s1206_s10  }
   0x9   :  { %1198 = dma.done.wait [#allocation3], 4096  }
   0xa   :  { %1199 = vsyncadd [#allocation3], 4294963200 }
   0xb   :  { %1200 = dma.done.wait [#allocation6], 4096  }
   0xc   :  { %1201 = vsyncadd [#allocation6], 4294963200  ;;  %v864_v0 = vld [vmem:[#allocation5 + $0xe0] sm:$0xf]  ;;  %v1080_v1 = vld [vmem:[#allocation5 + $0xec] sm:$0xf0] }
   0xd   :  { %v1078_v2 = vld [vmem:[#allocation5 + $0xe4] sm:$0xf]  ;;  %v865_v3 = vor.u32 %v1080_v1, %v864_v0  ;;  %v866_v4 = vld [vmem:[#allocation5 + $0xf0] sm:$0xf0]  ;;  %v872_v5 = vld [vmem:[#allocation5 + $0xe8] sm:$0xf] }
   0xe   :  { %v1081_v6 = vld [vmem:[#allocation5 + $0xf4] sm:$0xf0]  ;;  %v869_v7 = vor.u32 %v1078_v2, %v866_v4  ;;  %v1079_v9 = vld [vmem:[#allocation5 + $0xec] sm:$0xf]  ;;  %v874_v10 = vld [vmem:[#allocation5 + $0xf8] sm:$0xf0] }
   0xf   :  { %v873_v8 = vor.u32 %v1081_v6, %v872_v5  ;;  %v848_v11 = vld [vmem:[#allocation5 + $0xc0] sm:$0xf]  ;;  %292 = vmatpush.bf16.msra.mxu0 %v865_v3  ;;  %v877_v12 = vor.u32 %v1079_v9, %v874_v10  ;;  %v1076_v13 = vld [vmem:[#allocation5 + $0xcc] sm:$0xf0]  ;;  %v1074_v14 = vld [vmem:[#allocation5 + $0xc4] sm:$0xf] }
  0x10   :  { %v850_v15 = vld [vmem:[#allocation5 + $0xd0] sm:$0xf0]  ;;  %306 = vmatpush.bf16.msra.mxu1 %v869_v7  ;;  %v849_v16 = vor.u32 %v1076_v13, %v848_v11  ;;  %v856_v18 = vld [vmem:[#allocation5 + $0xc8] sm:$0xf]  ;;  %v1077_v19 = vld [vmem:[#allocation5 + $0xd4] sm:$0xf0] }
  0x11   :  { %320 = vmatpush.bf16.msra.mxu2 %v873_v8  ;;  %v853_v17 = vor.u32 %v1074_v14, %v850_v15  ;;  %v1075_v20 = vld [vmem:[#allocation5 + $0xcc] sm:$0xf]  ;;  %334 = vmatpush.bf16.msra.mxu3 %v877_v12  ;;  %v857_v21 = vor.u32 %v1077_v19, %v856_v18  ;;  %v858_v22 = vld [vmem:[#allocation5 + $0xd8] sm:$0xf0]  ;;  %v832_v23 = vld [vmem:[#allocation5 + $0xa0] sm:$0xf] }
  0x12   :  { %v1072_v24 = vld [vmem:[#allocation5 + $0xac] sm:$0xf0]  ;;  %v861_v25 = vor.u32 %v1075_v20, %v858_v22  ;;  %v1070_v26 = vld [vmem:[#allocation5 + $0xa4] sm:$0xf]  ;;  %v834_v27 = vld [vmem:[#allocation5 + $0xb0] sm:$0xf0] }
  0x13   :  { %v840_v28 = vld [vmem:[#allocation5 + $0xa8] sm:$0xf]  ;;  %293 = vmatpush.bf16.msra.mxu0 %v849_v16  ;;  %v833_v29 = vor.u32 %v1072_v24, %v832_v23  ;;  %v1073_v30 = vld [vmem:[#allocation5 + $0xb4] sm:$0xf0]  ;;  %v1071_v31 = vld [vmem:[#allocation5 + $0xac] sm:$0xf]  ;;  %v837_v33 = vor.u32 %v1070_v26, %v834_v27 }
  0x14   :  { %v842_v32 = vld [vmem:[#allocation5 + $0xb8] sm:$0xf0]  ;;  %307 = vmatpush.bf16.msra.mxu1 %v853_v17  ;;  %v841_v34 = vor.u32 %v1073_v30, %v840_v28  ;;  %v816_v35 = vld [vmem:[#allocation5 + $0x80] sm:$0xf]  ;;  %v1068_v36 = vld [vmem:[#allocation5 + $0x8c] sm:$0xf0] }
  0x15   :  { %321 = vmatpush.bf16.msra.mxu2 %v857_v21  ;;  %v1066_v37 = vld [vmem:[#allocation5 + $0x84] sm:$0xf]  ;;  %335 = vmatpush.bf16.msra.mxu3 %v861_v25  ;;  %v845_v38 = vor.u32 %v1071_v31, %v842_v32  ;;  %v818_v39 = vld [vmem:[#allocation5 + $0x90] sm:$0xf0]  ;;  %v824_v40 = vld [vmem:[#allocation5 + $0x88] sm:$0xf]  ;;  %v817_v44 = vor.u32 %v1068_v36, %v816_v35 }
  0x16   :  { %v1069_v41 = vld [vmem:[#allocation5 + $0x94] sm:$0xf0]  ;;  %v1067_v42 = vld [vmem:[#allocation5 + $0x8c] sm:$0xf]  ;;  %v826_v43 = vld [vmem:[#allocation5 + $0x98] sm:$0xf0]  ;;  %v821_v45 = vor.u32 %v1066_v37, %v818_v39 }
  0x17   :  { %294 = vmatpush.bf16.msra.mxu0 %v833_v29  ;;  %v825_v46 = vor.u32 %v1069_v41, %v824_v40  ;;  %v800_v47 = vld [vmem:[#allocation5 + $0x60] sm:$0xf]  ;;  %v1064_v48 = vld [vmem:[#allocation5 + $0x6c] sm:$0xf0]  ;;  %v1062_v49 = vld [vmem:[#allocation5 + $0x64] sm:$0xf]  ;;  %v829_v50 = vor.u32 %v1067_v42, %v826_v43 }
  0x18   :  { %308 = vmatpush.bf16.msra.mxu1 %v837_v33  ;;  %v802_v51 = vld [vmem:[#allocation5 + $0x70] sm:$0xf0]  ;;  %v808_v52 = vld [vmem:[#allocation5 + $0x68] sm:$0xf]  ;;  %v1065_v53 = vld [vmem:[#allocation5 + $0x74] sm:$0xf0]  ;;  %v801_v56 = vor.u32 %v1064_v48, %v800_v47 }
  0x19   :  { %322 = vmatpush.bf16.msra.mxu2 %v841_v34  ;;  %336 = vmatpush.bf16.msra.mxu3 %v845_v38  ;;  %v1063_v54 = vld [vmem:[#allocation5 + $0x6c] sm:$0xf]  ;;  %v810_v55 = vld [vmem:[#allocation5 + $0x78] sm:$0xf0]  ;;  %v805_v57 = vor.u32 %v1062_v49, %v802_v51  ;;  %v809_v58 = vor.u32 %v1065_v53, %v808_v52  ;;  %v784_v59 = vld [vmem:[#allocation5 + $0x40] sm:$0xf] }
  0x1a   :  { %v1060_v60 = vld [vmem:[#allocation5 + $0x4c] sm:$0xf0]  ;;  %v1058_v61 = vld [vmem:[#allocation5 + $0x44] sm:$0xf]  ;;  %v813_v62 = vor.u32 %v1063_v54, %v810_v55  ;;  %v786_v63 = vld [vmem:[#allocation5 + $0x50] sm:$0xf0] }
  0x1b   :  { %295 = vmatpush.bf16.msra.mxu0 %v817_v44  ;;  %v792_v0 = vld [vmem:[#allocation5 + $0x48] sm:$0xf]  ;;  %v1061_v1 = vld [vmem:[#allocation5 + $0x54] sm:$0xf0]  ;;  %v1059_v2 = vld [vmem:[#allocation5 + $0x4c] sm:$0xf]  ;;  %v785_v4 = vor.u32 %v1060_v60, %v784_v59  ;;  %v789_v5 = vor.u32 %v1058_v61, %v786_v63 }
  0x1c   :  { %309 = vmatpush.bf16.msra.mxu1 %v821_v45  ;;  %v794_v3 = vld [vmem:[#allocation5 + $0x58] sm:$0xf0]  ;;  %v793_v6 = vor.u32 %v1061_v1, %v792_v0  ;;  %v768_v7 = vld [vmem:[#allocation5 + $0x20] sm:$0xf]  ;;  %v1056_v8 = vld [vmem:[#allocation5 + $0x2c] sm:$0xf0] }
  0x1d   :  { %323 = vmatpush.bf16.msra.mxu2 %v825_v46  ;;  %337 = vmatpush.bf16.msra.mxu3 %v829_v50  ;;  %v1054_v9 = vld [vmem:[#allocation5 + $0x24] sm:$0xf]  ;;  %v797_v10 = vor.u32 %v1059_v2, %v794_v3  ;;  %v770_v11 = vld [vmem:[#allocation5 + $0x30] sm:$0xf0]  ;;  %v776_v12 = vld [vmem:[#allocation5 + $0x28] sm:$0xf]  ;;  %v769_v16 = vor.u32 %v1056_v8, %v768_v7 }
  0x1e   :  { %v1057_v13 = vld [vmem:[#allocation5 + $0x34] sm:$0xf0]  ;;  %v1055_v14 = vld [vmem:[#allocation5 + $0x2c] sm:$0xf]  ;;  %v778_v15 = vld [vmem:[#allocation5 + $0x38] sm:$0xf0]  ;;  %v773_v19 = vor.u32 %v1054_v9, %v770_v11 }
  0x1f   :  { %296 = vmatpush.bf16.msra.mxu0 %v801_v56  ;;  %v752_v17 = vld [vmem:[#allocation5] sm:$0xf]  ;;  %v1052_v18 = vld [vmem:[#allocation5 + $0xc] sm:$0xf0]  ;;  %v777_v20 = vor.u32 %v1057_v13, %v776_v12  ;;  %v1050_v21 = vld [vmem:[#allocation5 + $0x4] sm:$0xf]  ;;  %v781_v24 = vor.u32 %v1055_v14, %v778_v15 }
  0x20   :  { %310 = vmatpush.bf16.msra.mxu1 %v805_v57  ;;  %v754_v22 = vld [vmem:[#allocation5 + $0x10] sm:$0xf0]  ;;  %v760_v23 = vld [vmem:[#allocation5 + $0x8] sm:$0xf]  ;;  %v1053_v25 = vld [vmem:[#allocation5 + $0x14] sm:$0xf0]  ;;  %v753_v31 = vor.u32 %v1052_v18, %v752_v17 }
  0x21   :  { %324 = vmatpush.bf16.msra.mxu2 %v809_v58  ;;  %338 = vmatpush.bf16.msra.mxu3 %v813_v62  ;;  %v1051_v26 = vld [vmem:[#allocation5 + $0xc] sm:$0xf]  ;;  %v762_v27 = vld [vmem:[#allocation5 + $0x18] sm:$0xf0]  ;;  %v996_v28 = vld [vmem:[#allocation2 + $0xe0] sm:$0xf]  ;;  %v757_v35 = vor.u32 %v1050_v21, %v754_v22  ;;  %v761_v36 = vor.u32 %v1053_v25, %v760_v23 }
  0x22   :  { %v1047_v29 = vld [vmem:[#allocation2 + $0xec] sm:$0xf0]  ;;  %v1045_v30 = vld [vmem:[#allocation2 + $0xe4] sm:$0xf]  ;;  %v998_v32 = vld [vmem:[#allocation2 + $0xf0] sm:$0xf0]  ;;  %v765_v39 = vor.u32 %v1051_v26, %v762_v27 }
  0x23   :  { %297 = vmatpush.bf16.msra.mxu0 %v785_v4  ;;  %v1004_v33 = vld [vmem:[#allocation2 + $0xe8] sm:$0xf]  ;;  %v1048_v34 = vld [vmem:[#allocation2 + $0xf4] sm:$0xf0]  ;;  %v1046_v37 = vld [vmem:[#allocation2 + $0xec] sm:$0xf]  ;;  %v997_v40 = vor.u32 %v1047_v29, %v996_v28  ;;  %v1001_v42 = vor.u32 %v1045_v30, %v998_v32 }
  0x24   :  { %311 = vmatpush.bf16.msra.mxu1 %v789_v5  ;;  %v1006_v38 = vld [vmem:[#allocation2 + $0xf8] sm:$0xf0]  ;;  %v980_v41 = vld [vmem:[#allocation2 + $0xc0] sm:$0xf]  ;;  %v1005_v43 = vor.u32 %v1048_v34, %v1004_v33  ;;  %v1043_v44 = vld [vmem:[#allocation2 + $0xcc] sm:$0xf0] }
  0x25   :  { %325 = vmatpush.bf16.msra.mxu2 %v793_v6  ;;  %339 = vmatpush.bf16.msra.mxu3 %v797_v10  ;;  %v1041_v45 = vld [vmem:[#allocation2 + $0xc4] sm:$0xf]  ;;  %v982_v46 = vld [vmem:[#allocation2 + $0xd0] sm:$0xf0]  ;;  %v1009_v47 = vor.u32 %v1046_v37, %v1006_v38  ;;  %v988_v48 = vld [vmem:[#allocation2 + $0xc8] sm:$0xf]  ;;  %v981_v53 = vor.u32 %v1043_v44, %v980_v41 }
  0x26   :  { %v1044_v49 = vld [vmem:[#allocation2 + $0xd4] sm:$0xf0]  ;;  %v1049_v50 = vld [vmem:[%s1332_s1] sm:$0xff]  ;;  %v1042_v51 = vld [vmem:[#allocation2 + $0xcc] sm:$0xf]  ;;  %v985_v54 = vor.u32 %v1041_v45, %v982_v46  ;;  %s1208_s18 = smov [#allocation7]  }
  0x27   :  { %298 = vmatpush.bf16.msra.mxu0 %v769_v16  ;;  %v990_v52 = vld [vmem:[#allocation2 + $0xd8] sm:$0xf0]  ;;  %v989_v55 = vor.u32 %v1044_v49, %v988_v48  ;;  %v964_v56 = vld [vmem:[#allocation2 + $0xa0] sm:$0xf]  ;;  %v1039_v57 = vld [vmem:[#allocation2 + $0xac] sm:$0xf0] }
  0x28   :  { %312 = vmatpush.bf16.msra.mxu1 %v773_v19  ;;  %v1037_v58 = vld [vmem:[#allocation2 + $0xa4] sm:$0xf]  ;;  %v993_v59 = vor.u32 %v1042_v51, %v990_v52  ;;  %v966_v60 = vld [vmem:[#allocation2 + $0xb0] sm:$0xf0]  ;;  %v972_v61 = vld [vmem:[#allocation2 + $0xa8] sm:$0xf]  ;;  %v965_v1 = vor.u32 %v1039_v57, %v964_v56 }
  0x29   :  { %326 = vmatpush.bf16.msra.mxu2 %v777_v20  ;;  %340 = vmatpush.bf16.msra.mxu3 %v781_v24  ;;  %v1040_v62 = vld [vmem:[#allocation2 + $0xb4] sm:$0xf0]  ;;  %v1038_v63 = vld [vmem:[#allocation2 + $0xac] sm:$0xf]  ;;  %v974_v0 = vld [vmem:[#allocation2 + $0xb8] sm:$0xf0]  ;;  %v969_v2 = vor.u32 %v1037_v58, %v966_v60 }
  0x2a   :  { %v973_v3 = vor.u32 %v1040_v62, %v972_v61  ;;  %v948_v4 = vld [vmem:[#allocation2 + $0x80] sm:$0xf]  ;;  %v1035_v5 = vld [vmem:[#allocation2 + $0x8c] sm:$0xf0]  ;;  %v1033_v6 = vld [vmem:[#allocation2 + $0x84] sm:$0xf]  ;;  %v977_v7 = vor.u32 %v1038_v63, %v974_v0 }
  0x2b   :  { %299 = vmatpush.bf16.msra.mxu0 %v753_v31  ;;  %v950_v8 = vld [vmem:[#allocation2 + $0x90] sm:$0xf0]  ;;  %v956_v9 = vld [vmem:[#allocation2 + $0x88] sm:$0xf]  ;;  %v1036_v10 = vld [vmem:[#allocation2 + $0x94] sm:$0xf0]  ;;  %v949_v13 = vor.u32 %v1035_v5, %v948_v4 }
  0x2c   :  { %313 = vmatpush.bf16.msra.mxu1 %v757_v35  ;;  %v1034_v11 = vld [vmem:[#allocation2 + $0x8c] sm:$0xf]  ;;  %v958_v12 = vld [vmem:[#allocation2 + $0x98] sm:$0xf0]  ;;  %v953_v14 = vor.u32 %v1033_v6, %v950_v8  ;;  %v957_v15 = vor.u32 %v1036_v10, %v956_v9  ;;  %v932_v16 = vld [vmem:[#allocation2 + $0x60] sm:$0xf] }
  0x2d   :  { %327 = vmatpush.bf16.msra.mxu2 %v761_v36  ;;  %341 = vmatpush.bf16.msra.mxu3 %v765_v39  ;;  %v1031_v17 = vld [vmem:[#allocation2 + $0x6c] sm:$0xf0]  ;;  %v1029_v18 = vld [vmem:[#allocation2 + $0x64] sm:$0xf]  ;;  %v961_v19 = vor.u32 %v1034_v11, %v958_v12  ;;  %v934_v20 = vld [vmem:[#allocation2 + $0x70] sm:$0xf0] }
  0x2e   :  { %300 = vmatmul.bf16.vlgmr.msra.gmra.mxu0 %v1049_v50  ;;  %v940_v21 = vld [vmem:[#allocation2 + $0x68] sm:$0xf]  ;;  %v1032_v22 = vld [vmem:[#allocation2 + $0x74] sm:$0xf0]  ;;  %v1030_v23 = vld [vmem:[#allocation2 + $0x6c] sm:$0xf]  ;;  %v933_v25 = vor.u32 %v1031_v17, %v932_v16  ;;  %v937_v26 = vor.u32 %v1029_v18, %v934_v20 }
  0x2f   :  { %514 = vmatpush.bf16.msrb.mxu0 %v997_v40  ;;  %314 = vmatmul.bf16.vlgmr.msra.gmra.mxu1 %v1049_v50  ;;  %v942_v24 = vld [vmem:[#allocation2 + $0x78] sm:$0xf0]  ;;  %v941_v27 = vor.u32 %v1032_v22, %v940_v21  ;;  %v916_v28 = vld [vmem:[#allocation2 + $0x40] sm:$0xf]  ;;  %v1027_v29 = vld [vmem:[#allocation2 + $0x4c] sm:$0xf0] }
  0x30   :  { %528 = vmatpush.bf16.msrb.mxu1 %v1001_v42  ;;  %342 = vmatmul.bf16.vlgmr.msra.gmra.mxu3 %v1049_v50  ;;  %v1025_v30 = vld [vmem:[#allocation2 + $0x44] sm:$0xf]  ;;  %v945_v31 = vor.u32 %v1030_v23, %v942_v24  ;;  %v918_v32 = vld [vmem:[#allocation2 + $0x50] sm:$0xf0]  ;;  %v924_v33 = vld [vmem:[#allocation2 + $0x48] sm:$0xf]  ;;  %v917_v37 = vor.u32 %v1027_v29, %v916_v28 }
  0x31   :  { %542 = vmatpush.bf16.msrb.mxu2 %v1005_v43  ;;  %556 = vmatpush.bf16.msrb.mxu3 %v1009_v47  ;;  %v1028_v34 = vld [vmem:[#allocation2 + $0x54] sm:$0xf0]  ;;  %v1026_v35 = vld [vmem:[#allocation2 + $0x4c] sm:$0xf]  ;;  %v926_v36 = vld [vmem:[#allocation2 + $0x58] sm:$0xf0]  ;;  %v921_v38 = vor.u32 %v1025_v30, %v918_v32 }
  0x32   :  { %328 = vmatmul.bf16.vlgmr.msra.gmra.mxu2 %v1049_v50  ;;  %v925_v39 = vor.u32 %v1028_v34, %v924_v33  ;;  %v900_v40 = vld [vmem:[#allocation2 + $0x20] sm:$0xf]  ;;  %v1023_v41 = vld [vmem:[#allocation2 + $0x2c] sm:$0xf0]  ;;  %v1021_v42 = vld [vmem:[#allocation2 + $0x24] sm:$0xf]  ;;  %v929_v43 = vor.u32 %v1026_v35, %v926_v36 }
  0x33   :  { %515 = vmatpush.bf16.msrb.mxu0 %v981_v53  ;;  %v902_v44 = vld [vmem:[#allocation2 + $0x30] sm:$0xf0]  ;;  %v908_v45 = vld [vmem:[#allocation2 + $0x28] sm:$0xf]  ;;  %v1024_v46 = vld [vmem:[#allocation2 + $0x34] sm:$0xf0]  ;;  %v901_v49 = vor.u32 %v1023_v41, %v900_v40 }
  0x34   :  { %529 = vmatpush.bf16.msrb.mxu1 %v985_v54  ;;  %v1022_v47 = vld [vmem:[#allocation2 + $0x2c] sm:$0xf]  ;;  %v910_v48 = vld [vmem:[#allocation2 + $0x38] sm:$0xf0]  ;;  %v905_v50 = vor.u32 %v1021_v42, %v902_v44  ;;  %v909_v51 = vor.u32 %v1024_v46, %v908_v45  ;;  %v884_v52 = vld [vmem:[#allocation2] sm:$0xf] }
  0x35   :  { %543 = vmatpush.bf16.msrb.mxu2 %v989_v55  ;;  %557 = vmatpush.bf16.msrb.mxu3 %v993_v59  ;;  %v1019_v53 = vld [vmem:[#allocation2 + $0xc] sm:$0xf0]  ;;  %v1017_v54 = vld [vmem:[#allocation2 + $0x4] sm:$0xf]  ;;  %v913_v55 = vor.u32 %v1022_v47, %v910_v48  ;;  %v886_v56 = vld [vmem:[#allocation2 + $0x10] sm:$0xf0] }
  0x36   :  { %v892_v57 = vld [vmem:[#allocation2 + $0x8] sm:$0xf]  ;;  %v1020_v58 = vld [vmem:[#allocation2 + $0x14] sm:$0xf0]  ;;  %v1018_v59 = vld [vmem:[#allocation2 + $0xc] sm:$0xf]  ;;  %v885_v61 = vor.u32 %v1019_v53, %v884_v52  ;;  %v889_v62 = vor.u32 %v1017_v54, %v886_v56 }
  0x37   :  { %516 = vmatpush.bf16.msrb.mxu0 %v965_v1  ;;  %v894_v60 = vld [vmem:[#allocation2 + $0x18] sm:$0xf0]  ;;  %v893_v63 = vor.u32 %v1020_v58, %v892_v57  ;;  %v1016_v1 = vld [vmem:[%s1331_s0] sm:$0xff]  ;;  %s1306_s19 = sshll.u32 %s1208_s18, 4  ;;  %s730_s22 = sshll.u32 %s1338_s7, 4  ;;  %s729_s19 = int_to_ptr.vmem [resolvable:$true] %s1306_s19  ;;  %s731_s22 = int_to_ptr.hbm [resolvable:$true] %s730_s22 }
  0x38   :  { %530 = vmatpush.bf16.msrb.mxu1 %v969_v2  ;;  %v897_v0 = vor.u32 %v1018_v59, %v894_v60  ;;  %v1266_v8 = vld [vmem:[%s1336_s5] sm:$0xf]  ;;  %s1210_s7 = smov 8  }
  0x39   :  { %544 = vmatpush.bf16.msrb.mxu2 %v973_v3  ;;  %558 = vmatpush.bf16.msrb.mxu3 %v977_v7  ;;  %v572_v9 = vperm.slane %v1266_v8, 0  ;;  %v573_v12 = vperm.slane %v1266_v8, 1  ;;  %v575_v21 = vperm.slane %v1266_v8, 3  ;;  %v574_v40 = vperm.slane %v1266_v8, 2 }
  0x3b   :  { %517 = vmatpush.bf16.msrb.mxu0 %v949_v13 }
  0x3c   :  { %531 = vmatpush.bf16.msrb.mxu1 %v953_v14 }
  0x3d   :  { %545 = vmatpush.bf16.msrb.mxu2 %v957_v15  ;;  %559 = vmatpush.bf16.msrb.mxu3 %v961_v19 }
  0x3f   :  { %518 = vmatpush.bf16.msrb.mxu0 %v933_v25 }
  0x40   :  { %532 = vmatpush.bf16.msrb.mxu1 %v937_v26 }
  0x41   :  { %546 = vmatpush.bf16.msrb.mxu2 %v941_v27  ;;  %560 = vmatpush.bf16.msrb.mxu3 %v945_v31 }
  0x43   :  { %519 = vmatpush.bf16.msrb.mxu0 %v917_v37 }
  0x44   :  { %533 = vmatpush.bf16.msrb.mxu1 %v921_v38 }
  0x45   :  { %547 = vmatpush.bf16.msrb.mxu2 %v925_v39  ;;  %561 = vmatpush.bf16.msrb.mxu3 %v929_v43 }
  0x47   :  { %520 = vmatpush.bf16.msrb.mxu0 %v901_v49 }
  0x48   :  { %534 = vmatpush.bf16.msrb.mxu1 %v905_v50 }
  0x49   :  { %548 = vmatpush.bf16.msrb.mxu2 %v909_v51  ;;  %562 = vmatpush.bf16.msrb.mxu3 %v913_v55 }
  0x4b   :  { %521 = vmatpush.bf16.msrb.mxu0 %v885_v61 }
  0x4c   :  { %535 = vmatpush.bf16.msrb.mxu1 %v889_v62 }
  0x4d   :  { %549 = vmatpush.bf16.msrb.mxu2 %v893_v63  ;;  %563 = vmatpush.bf16.msrb.mxu3 %v897_v0 }
  0x4e   :  { %522 = vmatmul.bf16.vlgmr.msrb.gmra.mxu0 %v1016_v1 }
  0x4f   :  { %536 = vmatmul.bf16.vlgmr.msrb.gmra.mxu1 %v1016_v1 }
  0x50   :  { %550 = vmatmul.bf16.vlgmr.msrb.gmra.mxu2 %v1016_v1  ;;  %564 = vmatmul.bf16.vlgmr.msrb.gmra.mxu3 %v1016_v1 }
  0xab   :  { %v301_v2 = vpop.f32.mrf.mxu0 }
  0xac   :  { %v315_v3 = vpop.f32.mrf.mxu1 }
  0xb3   :  { %v343_v4 = vpop.f32.mrf.mxu3  ;;  %v303_v5 = vpop.f32.mrf.mxu0 }
  0xb4   :  { %v317_v6 = vpop.f32.mrf.mxu1 }
  0xb5   :  { %v329_v7 = vpop.f32.mrf.mxu2 }
  0xbb   :  { %v345_v10 = vpop.f32.mrf.mxu3 }
  0xbd   :  { %v1270_v16 = vpop.f32.mrf.mxu2 }
  0xcb   :  { %v523_v11 = vpop.f32.mrf.mxu0 }
  0xcc   :  { %v524_v13 = vadd.f32 %v523_v11, %v301_v2  ;;  %v537_v14 = vpop.f32.mrf.mxu1 }
  0xcd   :  { %v538_v15 = vadd.f32 %v537_v14, %v315_v3 }
  0xce   :  { %v580_v17 = vadd.f32 %v572_v9, %v524_v13 }
  0xcf   :  { %v581_v18 = vadd.f32 %v573_v12, %v538_v15 }
  0xd0   :  { %v1010_v19 = vmul.f32 -1.442695, %v580_v17 }
  0xd1   :  { %v1012_v20 = vmul.f32 -1.442695, %v581_v18 }
  0xd2   :  { %1094 = vpow2.f32 %v1010_v19 }
  0xd3   :  { %1096 = vpow2.f32 %v1012_v20  ;;  %v565_v22 = vpop.f32.mrf.mxu3  ;;  %v525_v23 = vpop.f32.mrf.mxu0 }
  0xd4   :  { %v566_v24 = vadd.f32 %v565_v22, %v343_v4  ;;  %v526_v25 = vadd.f32 %v525_v23, %v303_v5  ;;  %v539_v26 = vpop.f32.mrf.mxu1  ;;  %v551_v32 = vpop.f32.mrf.mxu2 }
  0xd5   :  { %v540_v27 = vadd.f32 %v539_v26, %v317_v6  ;;  %v552_v39 = vadd.f32 %v551_v32, %v329_v7 }
  0xd6   :  { %v583_v28 = vadd.f32 %v575_v21, %v566_v24  ;;  %v584_v29 = vadd.f32 %v572_v9, %v526_v25  ;;  %v704_v9 = vld [vmem:[%s1333_s2] sm:$0xff] }
  0xd7   :  { %v585_v30 = vadd.f32 %v573_v12, %v540_v27  ;;  %v582_v43 = vadd.f32 %v574_v40, %v552_v39  ;;  %v705_v39 = vld [vmem:[%s1333_s2 + $0x8] sm:$0xff]  ;;  %s1209_s2 = smov 128  }
  0xd8   :  { %v1095_v31 = vpop.eup %1094  ;;  %v1014_v33 = vmul.f32 -1.442695, %v583_v28  ;;  %v1011_v36 = vmul.f32 -1.442695, %v584_v29 }
  0xd9   :  { %v1097_v34 = vpop.eup %1096  ;;  %v594_v35 = vadd.f32 1.0, %v1095_v31  ;;  %v1013_v38 = vmul.f32 -1.442695, %v585_v30 }
  0xda   :  { %v632_v37 = vadd.f32 1.0, %v1097_v34  ;;  %1098 = vpow2.f32 %v1014_v33 }
  0xdb   :  { %1100 = vrcp.f32 %v594_v35  ;;  %v567_v41 = vpop.f32.mrf.mxu3  ;;  %v605_v55 = vand.u32 2147483647, %v594_v35  ;;  %v607_v58 = vand.u32 2147483648, %v594_v35  ;;  %vm601_vm2 = vweird.f32 %v594_v35 }
  0xdc   :  { %1102 = vrcp.f32 %v632_v37  ;;  %v568_v42 = vadd.f32 %v567_v41, %v345_v10  ;;  %v553_v60 = vpop.f32.mrf.mxu2  ;;  %v645_v61 = vand.u32 2147483648, %v632_v37  ;;  %v643_v0 = vand.u32 2147483647, %v632_v37 }
  0xdd   :  { %1104 = vpow2.f32 %v1011_v36  ;;  %v554_v2 = vadd.f32 %v553_v60, %v1270_v16  ;;  %vm639_vm3 = vweird.f32 %v632_v37  ;;  %v608_v4 = vor.u32 1.1754944e-38, %v607_v58 }
  0xde   :  { %1106 = vpow2.f32 %v1013_v38  ;;  %v587_v45 = vadd.f32 %v575_v21, %v568_v42  ;;  %v646_v7 = vor.u32 1.1754944e-38, %v645_v61  ;;  %vm606_vm6 = vcmp.eq.f32.partialorder %v605_v55, 8.507059e+37 }
  0xdf   :  { %1108 = vtanh.f32 %v582_v43  ;;  %vm644_vm7 = vcmp.eq.f32.partialorder %v643_v0, 8.507059e+37  ;;  %v586_v16 = vadd.f32 %v574_v40, %v554_v2 }
  0xe0   :  { %v1099_v44 = vpop.eup %1098  ;;  %v1015_v50 = vmul.f32 -1.442695, %v587_v45 }
  0xe1   :  { %v1101_v46 = vpop.eup %1100  ;;  %v1274_v47 = vadd.f32 1.0, %v1099_v44 }
  0xe2   :  { %v1103_v48 = vpop.eup %1102  ;;  %v597_v49 = vmul.f32 %v1101_v46, %v594_v35  ;;  %vm602_vm0 = vweird.f32 %v1101_v46 }
  0xe3   :  { %v1105_v51 = vpop.eup %1104  ;;  %v635_v52 = vmul.f32 %v1103_v48, %v632_v37  ;;  %1110 = vrcp.f32 %v1274_v47  ;;  %vm640_vm1 = vweird.f32 %v1103_v48  ;;  %vm603_vm4 = vmor %vm601_vm2, %vm602_vm0  ;;  %vm679_vm2 = vweird.f32 %v1274_v47 }
  0xe4   :  { %v1107_v53 = vpop.eup %1106  ;;  %v598_v54 = vsub.f32 1.0, %v597_v49  ;;  %v1277_v56 = vadd.f32 1.0, %v1105_v51  ;;  %1112 = vpow2.f32 %v1015_v50  ;;  %vm641_vm5 = vmor %vm639_vm3, %vm640_vm1 }
  0xe5   :  { %v636_v57 = vsub.f32 1.0, %v635_v52  ;;  %v1279_v59 = vadd.f32 1.0, %v1107_v53  ;;  %v1109_v3 = vpop.eup %1108 }
  0xe6   :  { %v599_v62 = vmul.f32 %v1101_v46, %v598_v54  ;;  %1114 = vrcp.f32 %v1277_v56  ;;  %v622_v26 = vand.u32 2147483648, %v1277_v56  ;;  %v620_v29 = vand.u32 2147483647, %v1277_v56 }
  0xe7   :  { %v637_v63 = vmul.f32 %v1103_v48, %v636_v57  ;;  %1116 = vrcp.f32 %v1279_v59  ;;  %v660_v27 = vand.u32 2147483648, %v1279_v59  ;;  %v658_v31 = vand.u32 2147483647, %v1279_v59 }
  0xe8   :  { %v600_v1 = vadd.f32 %v1101_v46, %v599_v62  ;;  %vm616_vm10 = vweird.f32 %v1277_v56  ;;  %vm654_vm11 = vweird.f32 %v1279_v59  ;;  %v623_v35 = vor.u32 1.1754944e-38, %v622_v26 }
  0xe9   :  { %v638_v5 = vadd.f32 %v1103_v48, %v637_v63  ;;  %v1284_v6 = vpop.eup %1110  ;;  %v661_v37 = vor.u32 1.1754944e-38, %v660_v27  ;;  %vm621_vm14 = vcmp.eq.f32.partialorder %v620_v29, 8.507059e+37  ;;  %vm659_vm15 = vcmp.eq.f32.partialorder %v658_v31, 8.507059e+37 }
  0xea   :  { %v604_v8 = vsel %vm603_vm4, %v1101_v46, %v600_v1  ;;  %v1113_v10 = vpop.eup %1112  ;;  %v675_v23 = vmul.f32 %v1284_v6, %v1274_v47  ;;  %vm680_vm0 = vweird.f32 %v1284_v6  ;;  %v685_v54 = vand.u32 2147483648, %v1274_v47 }
  0xeb   :  { %v609_v11 = vsel %vm606_vm6, %v608_v4, %v604_v8  ;;  %v642_v12 = vsel %vm641_vm5, %v1103_v48, %v638_v5  ;;  %v1289_v17 = vadd.f32 1.0, %v1113_v10  ;;  %vm1318_vm3 = vmor %vm679_vm2, %vm680_vm0  ;;  %v683_v57 = vand.u32 2147483647, %v1274_v47 }
  0xec   :  { %v1115_v13 = vpop.eup %1114  ;;  %v647_v14 = vsel %vm644_vm7, %v646_v7, %v642_v12  ;;  %v708_v15 = vmul.f32 %v1109_v3, %v609_v11  ;;  %v676_v32 = vsub.f32 1.0, %v675_v23  ;;  %v686_v62 = vor.u32 1.1754944e-38, %v685_v54 }
  0xed   :  { %v1117_v18 = vpop.eup %1116  ;;  %v706_v19 = vmul.f32 %v704_v9, %v647_v14  ;;  %v612_v20 = vmul.f32 %v1115_v13, %v1277_v56  ;;  %1118 = vrcp.f32 %v1289_v17  ;;  %vm617_vm8 = vweird.f32 %v1115_v13 }
  0xee   :  { %v650_v21 = vmul.f32 %v1117_v18, %v1279_v59  ;;  %1120 = vtanh.f32 %v586_v16  ;;  %vm655_vm9 = vweird.f32 %v1117_v18  ;;  %vm618_vm12 = vmor %vm616_vm10, %vm617_vm8  ;;  %v677_v44 = vmul.f32 %v1284_v6, %v676_v32 }
  0xef   :  { %v710_v22 = vadd.f32 %v708_v15, %v706_v19  ;;  %v613_v24 = vsub.f32 1.0, %v612_v20  ;;  %vm656_vm13 = vmor %vm654_vm11, %vm655_vm9  ;;  %v700_v55 = vand.u32 2147483648, %v1289_v17  ;;  %vm694_vm4 = vweird.f32 %v1289_v17 }
  0xf0   :  { %v651_v25 = vsub.f32 1.0, %v650_v21  ;;  %v678_v52 = vadd.f32 %v1284_v6, %v677_v44  ;;  %v698_v58 = vand.u32 2147483647, %v1289_v17  ;;  %vm684_vm6 = vcmp.eq.f32.partialorder %v683_v57, 8.507059e+37 }
  0xf1   :  { %720 = vst [vmem:[#allocation7] sm:$0xff] %v710_v22  ;;  %v614_v28 = vmul.f32 %v1115_v13, %v613_v24  ;;  %1122 = vtanh.f32 %v710_v22  ;;  %v701_v63 = vor.u32 1.1754944e-38, %v700_v55 }
  0xf2   :  { %v652_v30 = vmul.f32 %v1117_v18, %v651_v25  ;;  %v682_v59 = vsel %vm1318_vm3, %v1284_v6, %v678_v52  ;;  %vm699_vm7 = vcmp.eq.f32.partialorder %v698_v58, 8.507059e+37 }
  0xf3   :  { %v615_v33 = vadd.f32 %v1115_v13, %v614_v28  ;;  %v1119_v34 = vpop.eup %1118  ;;  %v687_v47 = vsel %vm684_vm6, %v686_v62, %v682_v59 }
  0xf4   :  { %v653_v36 = vadd.f32 %v1117_v18, %v652_v30  ;;  %v690_v40 = vmul.f32 %v1119_v34, %v1289_v17  ;;  %v1121_v41 = vpop.eup %1120  ;;  %vm695_vm1 = vweird.f32 %v1119_v34 }
  0xf5   :  { %v619_v38 = vsel %vm618_vm12, %v1115_v13, %v615_v33  ;;  %vm696_vm5 = vmor %vm694_vm4, %vm695_vm1 }
  0xf6   :  { %v624_v42 = vsel %vm621_vm14, %v623_v35, %v619_v38  ;;  %v657_v43 = vsel %vm656_vm13, %v1117_v18, %v653_v36  ;;  %v691_v48 = vsub.f32 1.0, %v690_v40 }
  0xf7   :  { %v662_v45 = vsel %vm659_vm15, %v661_v37, %v657_v43  ;;  %v709_v46 = vmul.f32 %v1121_v41, %v624_v42  ;;  %v1123_v61 = vpop.eup %1122 }
  0xf8   :  { %v707_v49 = vmul.f32 %v705_v39, %v662_v45  ;;  %v692_v50 = vmul.f32 %v1119_v34, %v691_v48  ;;  %v714_v2 = vmul.f32 %v1123_v61, %v687_v47 }
  0xfa   :  { %v711_v51 = vadd.f32 %v709_v46, %v707_v49  ;;  %v693_v53 = vadd.f32 %v1119_v34, %v692_v50 }
  0xfc   :  { %1124 = vtanh.f32 %v711_v51  ;;  %721 = vst [vmem:[#allocation7 + $0x8] sm:$0xff] %v711_v51  ;;  %v697_v60 = vsel %vm696_vm5, %v1119_v34, %v693_v53 }
  0xfd   :  { %736 = dma.vmem_to_hbm [thread:$0]  %s729_s19, 256, %s731_s22, [#allocation4], %s1209_s2, %s1209_s2, %s1210_s7   ;;  %v702_v1 = vsel %vm699_vm7, %v701_v63, %v697_v60 }
 0x102   :  { %v1125_v0 = vpop.eup %1124 }
 0x103   :  { %v715_v3 = vmul.f32 %v1125_v0, %v702_v1 }
 0x105   :  { %v1085_v4 = vpack.c.bf16 %v715_v3, %v714_v2 }
 0x107   :  { %1086 = vst [vmem:[%s1337_s6] sm:$0xff] %v1085_v4  }
 0x108   :  { %1202 = dma.done.wait [#allocation4], 256  }
 0x109   :  { %1203 = vsyncadd [#allocation4], 4294967040 }
 0x10a   :  { %743 = vsyncpa [#allocation3], 1 }
 0x10b   :  { %744 = vsyncpa [#allocation6], 1 }
 0x10c   :  { %745 = vsyncpa [#allocation4], 1 }

</bundles_post_ra>
